<compile_context>
chip_gen: v7x
topology: tpu7x:2x2x1
jax: 0.10.0
libtpu: 0.0.40
codegen_flags: <defaults>
</compile_context>

<pallas_src>
import math

import jax
import jax.numpy as jnp
from jax.experimental import pallas as pl
from jax.experimental.pallas import tpu as pltpu


def _round_up(x, m):
    return ((x + m - 1) // m) * m


# --------------------------------------------------------------------------- #
# Kernel
# --------------------------------------------------------------------------- #
def _mlp_actor_kernel(x_ref, w1_ref, b1_ref, w2_ref, b2_ref, w34_ref, b34_ref,
                      out_ref):
    # x_ref already holds the matmul dtype (cast in the wrapper); weights define
    # the MXU input dtype.  Accumulation + elementwise are f32.
    mm_dtype = w1_ref.dtype

    # fc1 + relu
    h = jnp.dot(x_ref[...], w1_ref[...],
                preferred_element_type=jnp.float32) + b1_ref[...]
    h = jnp.maximum(h, 0.0)

    # fc2 + relu
    h = jnp.dot(h.astype(mm_dtype), w2_ref[...],
                preferred_element_type=jnp.float32) + b2_ref[...]
    h = jnp.maximum(h, 0.0)

    # fused heads: [fc3 | fc4] in one MXU pass
    y = jnp.dot(h.astype(mm_dtype), w34_ref[...],
                preferred_element_type=jnp.float32) + b34_ref[...]

    # Left half = mean (unclipped), right half = log_std clipped to [-20, 2].
    # One wide lane-dense store instead of two narrower ones.
    a_p = y.shape[-1] // 2
    col = jax.lax.broadcasted_iota(jnp.int32, y.shape, 1)
    out_ref[...] = jnp.where(col < a_p, y, jnp.clip(y, -20.0, 2.0))


# --------------------------------------------------------------------------- #
# One-time parameter packing (hoisted out of the per-call path)
# --------------------------------------------------------------------------- #
def pack_actor_params(params, *, weight_dtype=jnp.bfloat16):
    """Pad / concat / cast the MLPActor weights once; reuse every forward."""
    w1, b1, w2, b2, w3, b3, w4, b4 = params
    dim_state, hidden = w1.shape
    dim_action = w3.shape[1]

    f32 = jnp.float32
    s_p = _round_up(dim_state, 128)
    h_p = _round_up(hidden, 128)
    a_p = _round_up(dim_action, 128)

    w1_p = jnp.pad(w1, ((0, s_p - dim_state), (0, h_p - hidden))).astype(weight_dtype)
    w2_p = jnp.pad(w2, ((0, h_p - hidden), (0, h_p - hidden))).astype(weight_dtype)
    w34_p = jnp.concatenate(
        [jnp.pad(w3, ((0, h_p - hidden), (0, a_p - dim_action))),
         jnp.pad(w4, ((0, h_p - hidden), (0, a_p - dim_action)))],
        axis=1).astype(weight_dtype)

    b1_p = jnp.pad(b1.reshape(1, -1).astype(f32), ((0, 0), (0, h_p - hidden)))
    b2_p = jnp.pad(b2.reshape(1, -1).astype(f32), ((0, 0), (0, h_p - hidden)))
    b34_p = jnp.concatenate(
        [jnp.pad(b3.reshape(1, -1).astype(f32), ((0, 0), (0, a_p - dim_action))),
         jnp.pad(b4.reshape(1, -1).astype(f32), ((0, 0), (0, a_p - dim_action)))],
        axis=1)

    packed = (w1_p, b1_p, w2_p, b2_p, w34_p, b34_p)
    meta = dict(dim_state=dim_state, dim_action=dim_action, hidden=hidden,
                s_p=s_p, h_p=h_p, a_p=a_p, weight_dtype=weight_dtype)
    return packed, meta


# --------------------------------------------------------------------------- #
# Forward
# --------------------------------------------------------------------------- #
def mlp_actor_forward(x, packed, meta, *, block_batch=1024):
    """Fused MLPActor forward. Returns (mean, log_std), shapes (B, dim_action)."""
    w1_p, b1_p, w2_p, b2_p, w34_p, b34_p = packed
    batch, dim_state = x.shape
    assert dim_state == meta["dim_state"]

    f32 = jnp.float32
    weight_dtype = meta["weight_dtype"]
    in_itemsize = jnp.dtype(weight_dtype).itemsize
    s_p, h_p, a_p = meta["s_p"], meta["h_p"], meta["a_p"]
    dim_action = meta["dim_action"]

    # Batch padded only to a multiple of 8; ragged last grid block is masked.
    b_p = _round_up(batch, 8)
    tb = min(_round_up(block_batch, 8), b_p)
    grid = (pl.cdiv(b_p, tb),)

    # x: pad + cast to the matmul dtype once (the only per-step DMA stream).
    x_p = jnp.pad(x, ((0, b_p - batch), (0, s_p - dim_state))).astype(weight_dtype)

    row = lambda i: (i, 0)      # batch-tiled arrays
    const = lambda i: (0, 0)    # weights/biases: VMEM-resident, single-buffered
    wspec = lambda shape: pl.BlockSpec(shape, const, pipeline_mode=pl.Buffered(1))

    in_specs = [
        pl.BlockSpec((tb, s_p), row),
        wspec((s_p, h_p)),
        wspec((1, h_p)),
        wspec((h_p, h_p)),
        wspec((1, h_p)),
        wspec((h_p, 2 * a_p)),
        wspec((1, 2 * a_p)),
    ]
    # Single fused lane-dense output: [mean | clipped log_std].
    out_specs = pl.BlockSpec((tb, 2 * a_p), row)
    out_shape = jax.ShapeDtypeStruct((b_p, 2 * a_p), f32)

    # Advisory cost estimate (padded dims; dtypes reflected in byte counts).
    flops = 2 * b_p * (s_p * h_p + h_p * h_p + h_p * 2 * a_p)
    weight_bytes = (w1_p.size + w2_p.size + w34_p.size) * in_itemsize
    bias_bytes = (b1_p.size + b2_p.size + b34_p.size) * 4
    bytes_accessed = (b_p * s_p * in_itemsize      # x in
                      + weight_bytes + bias_bytes  # params in
                      + b_p * 2 * a_p * 4)         # fused out
    cost = pl.CostEstimate(flops=flops, transcendentals=0,
                           bytes_accessed=bytes_accessed)

    # VMEM budget: double-buffered x/out blocks, single-buffered weights,
    # plus intermediate h (f32 + bf16 copy) and headroom.
    needed = (2 * tb * s_p * in_itemsize
              + weight_bytes + bias_bytes
              + 2 * tb * 2 * a_p * 4
              + tb * h_p * (4 + in_itemsize)
              + tb * 2 * a_p * 4)
    vmem_limit = int(min(128 << 20, max(2 * needed, 32 << 20)))

    out_p = pl.pallas_call(
        _mlp_actor_kernel,
        out_shape=out_shape,
        grid=grid,
        in_specs=in_specs,
        out_specs=out_specs,
        compiler_params=pltpu.CompilerParams(
            # TODO(synk): on v7x verify the batch axis actually shards across
            # both TensorCores; if not, switch to pltpu.CORE_PARALLEL.
            dimension_semantics=("parallel",),
            vmem_limit_bytes=vmem_limit),
        cost_estimate=cost,
    )(x_p, w1_p, b1_p, w2_p, b2_p, w34_p, b34_p)

    mean = out_p[:batch, :dim_action]
    log_std = out_p[:batch, a_p:a_p + dim_action]
    return mean, log_std


# --------------------------------------------------------------------------- #
# Init + reference
# --------------------------------------------------------------------------- #
def xavier_uniform(key, fan_in, fan_out, gain=1.0):
    # Matches torch.nn.init.xavier_uniform_; stored as (in, out).
    limit = gain * math.sqrt(6.0 / (fan_in + fan_out))
    return jax.random.uniform(
        key, (fan_in, fan_out), dtype=jnp.float32, minval=-limit, maxval=limit)


def init_params(key, dim_state, dim_action, hidden_dim):
    k1, k2, k3, k4 = jax.random.split(key, 4)
    w1 = xavier_uniform(k1, dim_state, hidden_dim)
    b1 = jnp.zeros((1, hidden_dim), jnp.float32)
    w2 = xavier_uniform(k2, hidden_dim, hidden_dim)
    b2 = jnp.zeros((1, hidden_dim), jnp.float32)
    w3 = xavier_uniform(k3, hidden_dim, dim_action)
    b3 = jnp.zeros((1, dim_action), jnp.float32)
    w4 = xavier_uniform(k4, hidden_dim, dim_action)
    b4 = jnp.zeros((1, dim_action), jnp.float32)
    return (w1, b1, w2, b2, w3, b3, w4, b4)


def reference_forward(x, params):
    w1, b1, w2, b2, w3, b3, w4, b4 = params
    h = jnp.maximum(x @ w1 + b1, 0.0)
    h = jnp.maximum(h @ w2 + b2, 0.0)
    mean = h @ w3 + b3
    log_std = jnp.clip(h @ w4 + b4, -20.0, 2.0)
    return mean, log_std


# TODO(synk): sample()/sample2() (stochastic tanh-squashed sampling) are not part
# of forward(); they remain host-side JAX if needed.

if __name__ == "__main__":
    key = jax.random.PRNGKey(0)

    # --- small test, bf16 (default) matmul path ---
    dim_state, dim_action, hidden_dim = 16, 8, 32
    batch = 4
    k_x, k_p, k_x2, k_p2 = jax.random.split(key, 4)
    x = jax.random.normal(k_x, (batch, dim_state), dtype=jnp.float32)
    params = init_params(k_p, dim_state, dim_action, hidden_dim)
    mean_ref, log_std_ref = reference_forward(x, params)

    packed_bf16, meta_bf16 = pack_actor_params(params)  # bf16 weights (default)
    mean_bf, log_std_bf = mlp_actor_forward(x, packed_bf16, meta_bf16)
    jax.block_until_ready((mean_bf, log_std_bf))
    assert mean_bf.shape == (batch, dim_action)
    assert log_std_bf.shape == (batch, dim_action)
    assert jnp.allclose(mean_bf, mean_ref, atol=5e-2, rtol=5e-2)
    assert jnp.allclose(log_std_bf, log_std_ref, atol=5e-2, rtol=5e-2)

    # --- f32 matmul-input path (tight tolerance) ---
    packed_f32, meta_f32 = pack_actor_params(params, weight_dtype=jnp.float32)
    mean_f, log_std_f = mlp_actor_forward(x, packed_f32, meta_f32)
    jax.block_until_ready((mean_f, log_std_f))
    assert jnp.allclose(mean_f, mean_ref, atol=1e-4)
    assert jnp.allclose(log_std_f, log_std_ref, atol=1e-4)

    # --- multi-step batch grid with ragged final block + non-aligned dims ---
    ds2, da2, hd2, batch2 = 24, 6, 64, 50
    x2 = jax.random.normal(k_x2, (batch2, ds2), dtype=jnp.float32)
    params2 = init_params(k_p2, ds2, da2, hd2)
    packed2, meta2 = pack_actor_params(params2, weight_dtype=jnp.float32)
    m2, ls2 = mlp_actor_forward(x2, packed2, meta2, block_batch=16)
    jax.block_until_ready((m2, ls2))
    m2_ref, ls2_ref = reference_forward(x2, params2)
    assert m2.shape == (batch2, da2) and ls2.shape == (batch2, da2)
    assert jnp.allclose(m2, m2_ref, atol=1e-4)
    assert jnp.allclose(ls2, ls2_ref, atol=1e-4)

    print("KERNEL_OK")
</pallas_src>

<mosaic_0001>
module attributes {stable_mosaic.version = 11 : i64} {
  func.func @_mlp_actor_kernel(%arg0: i32, %arg1: memref<8x128xbf16, #tpu.memory_space<vmem>>, %arg2: memref<128x128xbf16, #tpu.memory_space<vmem>>, %arg3: memref<1x128xf32, #tpu.memory_space<vmem>>, %arg4: memref<128x128xbf16, #tpu.memory_space<vmem>>, %arg5: memref<1x128xf32, #tpu.memory_space<vmem>>, %arg6: memref<128x256xbf16, #tpu.memory_space<vmem>>, %arg7: memref<1x256xf32, #tpu.memory_space<vmem>>, %arg8: memref<8x256xf32, #tpu.memory_space<vmem>>) attributes {dimension_semantics = [#tpu.dimension_semantics<parallel>], iteration_bounds = array<i64: 1>, scalar_prefetch = 0 : i64, scratch_operands = 0 : i64, tpu.core_type = #tpu.core_type<tc>, window_params = [{transform_indices = @transform_0, window_bounds = array<i64: 8, 128>}, {pipeline_mode = #tpu.pipeline_mode<synchronous>, transform_indices = @transform_1, window_bounds = array<i64: 128, 128>}, {pipeline_mode = #tpu.pipeline_mode<synchronous>, transform_indices = @transform_2, window_bounds = array<i64: 1, 128>}, {pipeline_mode = #tpu.pipeline_mode<synchronous>, transform_indices = @transform_3, window_bounds = array<i64: 128, 128>}, {pipeline_mode = #tpu.pipeline_mode<synchronous>, transform_indices = @transform_4, window_bounds = array<i64: 1, 128>}, {pipeline_mode = #tpu.pipeline_mode<synchronous>, transform_indices = @transform_5, window_bounds = array<i64: 128, 256>}, {pipeline_mode = #tpu.pipeline_mode<synchronous>, transform_indices = @transform_6, window_bounds = array<i64: 1, 256>}, {transform_indices = @transform_7, window_bounds = array<i64: 8, 256>}]} {
    %c0 = arith.constant 0 : index
    %c0_0 = arith.constant 0 : index
    %0 = vector.load %arg1[%c0, %c0_0] : memref<8x128xbf16, #tpu.memory_space<vmem>>, vector<8x128xbf16>
    %c0_1 = arith.constant 0 : index
    %c0_2 = arith.constant 0 : index
    %1 = vector.load %arg2[%c0_1, %c0_2] : memref<128x128xbf16, #tpu.memory_space<vmem>>, vector<128x128xbf16>
    %cst = arith.constant dense<0.000000e+00> : vector<8x128xf32>
    %2 = tpu.matmul %0, %1, %cst {dimension_numbers = #tpu.dot_dimension_numbers<[1], [0], [0], [1], [0, 0, 1, 1], [], []>} : vector<8x128xbf16>, vector<128x128xbf16>, vector<8x128xf32> -> vector<8x128xf32>
    %c0_3 = arith.constant 0 : index
    %c0_4 = arith.constant 0 : index
    %3 = vector.load %arg3[%c0_3, %c0_4] : memref<1x128xf32, #tpu.memory_space<vmem>>, vector<1x128xf32>
    %4 = vector.broadcast %3 : vector<1x128xf32> to vector<8x128xf32>
    %5 = arith.addf %2, %4 : vector<8x128xf32>
    %cst_5 = arith.constant 0.000000e+00 : f32
    %6 = vector.broadcast %cst_5 : f32 to vector<8x128xf32>
    %7 = arith.maximumf %5, %6 : vector<8x128xf32>
    %8 = arith.truncf %7 : vector<8x128xf32> to vector<8x128xbf16>
    %c0_6 = arith.constant 0 : index
    %c0_7 = arith.constant 0 : index
    %9 = vector.load %arg4[%c0_6, %c0_7] : memref<128x128xbf16, #tpu.memory_space<vmem>>, vector<128x128xbf16>
    %cst_8 = arith.constant dense<0.000000e+00> : vector<8x128xf32>
    %10 = tpu.matmul %8, %9, %cst_8 {dimension_numbers = #tpu.dot_dimension_numbers<[1], [0], [0], [1], [0, 0, 1, 1], [], []>} : vector<8x128xbf16>, vector<128x128xbf16>, vector<8x128xf32> -> vector<8x128xf32>
    %c0_9 = arith.constant 0 : index
    %c0_10 = arith.constant 0 : index
    %11 = vector.load %arg5[%c0_9, %c0_10] : memref<1x128xf32, #tpu.memory_space<vmem>>, vector<1x128xf32>
    %12 = vector.broadcast %11 : vector<1x128xf32> to vector<8x128xf32>
    %13 = arith.addf %10, %12 : vector<8x128xf32>
    %cst_11 = arith.constant 0.000000e+00 : f32
    %14 = vector.broadcast %cst_11 : f32 to vector<8x128xf32>
    %15 = arith.maximumf %13, %14 : vector<8x128xf32>
    %16 = arith.truncf %15 : vector<8x128xf32> to vector<8x128xbf16>
    %c0_12 = arith.constant 0 : index
    %c0_13 = arith.constant 0 : index
    %17 = vector.load %arg6[%c0_12, %c0_13] : memref<128x256xbf16, #tpu.memory_space<vmem>>, vector<128x256xbf16>
    %cst_14 = arith.constant dense<0.000000e+00> : vector<8x256xf32>
    %18 = tpu.matmul %16, %17, %cst_14 {dimension_numbers = #tpu.dot_dimension_numbers<[1], [0], [0], [1], [0, 0, 1, 1], [], []>} : vector<8x128xbf16>, vector<128x256xbf16>, vector<8x256xf32> -> vector<8x256xf32>
    %c0_15 = arith.constant 0 : index
    %c0_16 = arith.constant 0 : index
    %19 = vector.load %arg7[%c0_15, %c0_16] : memref<1x256xf32, #tpu.memory_space<vmem>>, vector<1x256xf32>
    %20 = vector.broadcast %19 : vector<1x256xf32> to vector<8x256xf32>
    %21 = arith.addf %18, %20 : vector<8x256xf32>
    %22 = tpu.iota {dimensions = array<i32: 1>} : vector<8x256xi32>
    %c128_i32 = arith.constant 128 : i32
    %23 = vector.broadcast %c128_i32 : i32 to vector<8x256xi32>
    %24 = arith.cmpi slt, %22, %23 : vector<8x256xi32>
    %cst_17 = arith.constant -2.000000e+01 : f32
    %cst_18 = arith.constant 2.000000e+00 : f32
    %25 = vector.broadcast %cst_17 : f32 to vector<8x256xf32>
    %26 = arith.maximumf %25, %21 : vector<8x256xf32>
    %27 = vector.broadcast %cst_18 : f32 to vector<8x256xf32>
    %28 = arith.minimumf %27, %26 : vector<8x256xf32>
    %29 = arith.select %24, %21, %28 : vector<8x256xi1>, vector<8x256xf32>
    %c0_19 = arith.constant 0 : index
    %c0_20 = arith.constant 0 : index
    %30 = vector.load %arg8[%c0_19, %c0_20] : memref<8x256xf32, #tpu.memory_space<vmem>>, vector<8x256xf32>
    tpu.vector_store %arg8[%c0_19, %c0_20], %29 {strides = array<i32>} : memref<8x256xf32, #tpu.memory_space<vmem>>, vector<8x256xf32>,
    return
  }
  func.func @transform_0(%arg0: i32) -> (i32, i32) {
    %c0_i32 = arith.constant 0 : i32
    %c0_i32_0 = arith.constant 0 : i32
    return %arg0, %c0_i32 : i32, i32
  }
  func.func @transform_1(%arg0: i32) -> (i32, i32) {
    %c0_i32 = arith.constant 0 : i32
    %c0_i32_0 = arith.constant 0 : i32
    %c0_i32_1 = arith.constant 0 : i32
    return %c0_i32, %c0_i32_0 : i32, i32
  }
  func.func @transform_2(%arg0: i32) -> (i32, i32) {
    %c0_i32 = arith.constant 0 : i32
    %c0_i32_0 = arith.constant 0 : i32
    %c0_i32_1 = arith.constant 0 : i32
    return %c0_i32, %c0_i32_0 : i32, i32
  }
  func.func @transform_3(%arg0: i32) -> (i32, i32) {
    %c0_i32 = arith.constant 0 : i32
    %c0_i32_0 = arith.constant 0 : i32
    %c0_i32_1 = arith.constant 0 : i32
    return %c0_i32, %c0_i32_0 : i32, i32
  }
  func.func @transform_4(%arg0: i32) -> (i32, i32) {
    %c0_i32 = arith.constant 0 : i32
    %c0_i32_0 = arith.constant 0 : i32
    %c0_i32_1 = arith.constant 0 : i32
    return %c0_i32, %c0_i32_0 : i32, i32
  }
  func.func @transform_5(%arg0: i32) -> (i32, i32) {
    %c0_i32 = arith.constant 0 : i32
    %c0_i32_0 = arith.constant 0 : i32
    %c0_i32_1 = arith.constant 0 : i32
    return %c0_i32, %c0_i32_0 : i32, i32
  }
  func.func @transform_6(%arg0: i32) -> (i32, i32) {
    %c0_i32 = arith.constant 0 : i32
    %c0_i32_0 = arith.constant 0 : i32
    %c0_i32_1 = arith.constant 0 : i32
    return %c0_i32, %c0_i32_0 : i32, i32
  }
  func.func @transform_7(%arg0: i32) -> (i32, i32) {
    %c0_i32 = arith.constant 0 : i32
    %c0_i32_0 = arith.constant 0 : i32
    return %arg0, %c0_i32 : i32, i32
  }
}

</mosaic_0001>

<bundles_post_ra>
// kernel: tpu_custom_call.1
= control target key start
LH: loop header
LB: loop body
LE: loop exit
PB: predicated region body
PF: predicated region fallthrough
CT: control target
= control target key end

     0   :  { %12 = vsyncpa [#allocation3], 0  ;;  %s876_s0 = inlined_call_operand.hbm [shape: bf16[8,128], index: 0, kind: input, shape index: {}]   ;;  %s877_s1 = inlined_call_operand.hbm [shape: bf16[128,128], index: 1, kind: input, shape index: {}]   ;;  %s878_s2 = inlined_call_operand.vmem [shape: f32[1,128], index: 2, kind: input, shape index: {}]   ;;  %s879_s3 = inlined_call_operand.hbm [shape: bf16[128,128], index: 3, kind: input, shape index: {}]   ;;  %s880_s4 = inlined_call_operand.vmem [shape: f32[1,128], index: 4, kind: input, shape index: {}]   ;;  %s881_s5 = inlined_call_operand.hbm [shape: bf16[128,256], index: 5, kind: input, shape index: {}]   ;;  %s882_s6 = inlined_call_operand.vmem [shape: f32[1,256], index: 6, kind: input, shape index: {}]   ;;  %s883_s7 = inlined_call_operand.hbm [shape: f32[8,256], index: 7, kind: output, shape index: {}]  }
   0x1   :  { %13 = vsyncpa [#allocation6], 0 }
   0x2   :  { %14 = vsyncpa [#allocation9], 0 }
   0x3   :  { %15 = vsyncpa [#allocation4], 0  ;;  %s749_s24 = smov [#allocation5]   ;;  %s631_s28 = scalar_lea.hbm %s877_s1, 1024 }
   0x4   :  { %s31_s25 = sshll.u32 %s749_s24, 4  ;;  %p632_p0 = scmp.ne.s32.totalorder %s877_s1, %s631_s28  ;;  %s32_s25 = int_to_ptr.vmem [resolvable:$true] %s31_s25 }
   0x5   :  { %p635_p1 = scmp.lt.u32.totalorder %s631_s28, %s877_s1 }
   0x7   :  { %p637_p2 = pnand %p635_p1, %p632_p0 }
   0x9   :  { %640 = shalt.err (!%p637_p2)
}
   0xa   :  { %s641_s10 = scalar_lea.vmem %s32_s25, 1024  ;;  %p646_p4 = scmp.lt.s32.totalorder %s32_s25, %s32_s25 }
   0xb   :  { %p642_p3 = scmp.ne.s32.totalorder %s32_s25, %s641_s10  ;;  %p647_p5 = scmp.lt.s32.totalorder %s641_s10, %s641_s10 }
   0xd   :  { %p648_p6 = por %p647_p5, %p646_p4 }
   0xf   :  { %p649_p7 = pnand %p648_p6, %p642_p3 }
  0x11   :  { %652 = shalt.err (!%p649_p7)
}
  0x12   :  { %s750_s11 = smov 64   ;;  %s751_s12 = smov 4  }
  0x13   :  { %37 = dma.hbm_to_vmem [thread:$0]  %s877_s1, 1024, %s32_s25, [#allocation6], %s750_s11, %s750_s11, %s751_s12  }
  0x14   :  { %s752_s15 = smov [#allocation2]   ;;  %s753_s17 = smov [#allocation7]  }
  0x15   :  { %s22_s16 = sshll.u32 %s752_s15, 4  ;;  %s45_s18 = sshll.u32 %s753_s17, 4  ;;  %s23_s16 = int_to_ptr.vmem [resolvable:$true] %s22_s16  ;;  %s46_s18 = int_to_ptr.vmem [resolvable:$true] %s45_s18 }
  0x16   :  { %s653_s21 = scalar_lea.hbm %s876_s0, 64 }
  0x17   :  { %p654_p8 = scmp.ne.s32.totalorder %s876_s0, %s653_s21  ;;  %p657_p9 = scmp.lt.u32.totalorder %s653_s21, %s876_s0 }
  0x19   :  { %p659_p10 = pnand %p657_p9, %p654_p8 }
  0x1b   :  { %662 = shalt.err (!%p659_p10)
}
  0x1c   :  { %s663_s1 = scalar_lea.vmem %s23_s16, 64  ;;  %p668_p12 = scmp.lt.s32.totalorder %s23_s16, %s23_s16 }
  0x1d   :  { %p664_p11 = scmp.ne.s32.totalorder %s23_s16, %s663_s1  ;;  %p669_p13 = scmp.lt.s32.totalorder %s663_s1, %s663_s1 }
  0x1f   :  { %p670_p0 = por %p669_p13, %p668_p12 }
  0x21   :  { %p671_p1 = pnand %p670_p0, %p664_p11 }
  0x23   :  { %674 = shalt.err (!%p671_p1)
}
  0x24   :  { %25 = dma.hbm_to_vmem [thread:$0]  %s876_s0, 64, %s23_s16, [#allocation3]  }
  0x25   :  { %s675_s30 = scalar_lea.hbm %s879_s3, 1024 }
  0x26   :  { %p676_p2 = scmp.ne.s32.totalorder %s879_s3, %s675_s30  ;;  %p679_p3 = scmp.lt.u32.totalorder %s675_s30, %s879_s3 }
  0x28   :  { %p681_p4 = pnand %p679_p3, %p676_p2 }
  0x2a   :  { %684 = shalt.err (!%p681_p4)
}
  0x2b   :  { %s685_s14 = scalar_lea.vmem %s46_s18, 1024  ;;  %p690_p6 = scmp.lt.s32.totalorder %s46_s18, %s46_s18 }
  0x2c   :  { %p686_p5 = scmp.ne.s32.totalorder %s46_s18, %s685_s14  ;;  %p691_p7 = scmp.lt.s32.totalorder %s685_s14, %s685_s14 }
  0x2e   :  { %p692_p8 = por %p691_p7, %p690_p6 }
  0x30   :  { %p693_p9 = pnand %p692_p8, %p686_p5 }
  0x32   :  { %696 = shalt.err (!%p693_p9)
}
  0x33   :  { %51 = dma.hbm_to_vmem [thread:$0]  %s879_s3, 1024, %s46_s18, [#allocation6], %s750_s11, %s750_s11, %s751_s12  }
  0x34   :  { %s754_s16 = smov [#allocation8]   ;;  %s697_s21 = scalar_lea.hbm %s881_s5, 2048 }
  0x35   :  { %s59_s17 = sshll.u32 %s754_s16, 4  ;;  %p698_p10 = scmp.ne.s32.totalorder %s881_s5, %s697_s21  ;;  %s60_s17 = int_to_ptr.vmem [resolvable:$true] %s59_s17 }
  0x36   :  { %p701_p11 = scmp.lt.u32.totalorder %s697_s21, %s881_s5 }
  0x38   :  { %p703_p12 = pnand %p701_p11, %p698_p10 }
  0x3a   :  { %706 = shalt.err (!%p703_p12)
}
  0x3b   :  { %s707_s1 = scalar_lea.vmem %s60_s17, 2048  ;;  %p712_p0 = scmp.lt.s32.totalorder %s60_s17, %s60_s17 }
  0x3c   :  { %p708_p13 = scmp.ne.s32.totalorder %s60_s17, %s707_s1  ;;  %p713_p1 = scmp.lt.s32.totalorder %s707_s1, %s707_s1 }
  0x3e   :  { %p714_p2 = por %p713_p1, %p712_p0 }
  0x40   :  { %p715_p3 = pnand %p714_p2, %p708_p13 }
  0x42   :  { %718 = shalt.err (!%p715_p3)
}
  0x43   :  { %s755_s3 = smov 128   ;;  %s756_s11 = smov 8  }
  0x44   :  { %65 = dma.hbm_to_vmem [thread:$0]  %s881_s5, 2048, %s60_s17, [#allocation9], %s755_s3, %s755_s3, %s756_s11  }
  0x45   :  { %741 = dma.done.wait [#allocation3], 64  }
  0x46   :  { %742 = vsyncadd [#allocation3], 4294967232 }
  0x47   :  { %743 = dma.done.wait [#allocation6], 2048  }
  0x48   :  { %744 = vsyncadd [#allocation6], 4294965248 }
  0x49   :  { %745 = dma.done.wait [#allocation9], 2048  }
  0x4a   :  { %746 = vsyncadd [#allocation9], 4294965248  ;;  %v757_v0 = vmov 0.0   ;;  %vm758_vm0 = vmmov 0   ;;  %v591_v1 = vld [vmem:[#allocation5] sm:$0xff]   ;;  %v592_v2 = vld [vmem:[#allocation5 + $0x8] sm:$0xff]   ;;  %v326_v51 = vlaneseq }
  0x4b   :  { %539 = vmatprep.subr.bf16.mxu0 %v757_v0  ;;  %555 = vmatprep.mubr.msk.bf16.mxu0 %vm758_vm0, %v757_v0  ;;  %v593_v3 = vld [vmem:[#allocation5 + $0x10] sm:$0xff]   ;;  %v599_v4 = vld [vmem:[#allocation7] sm:$0xff]   ;;  %v594_v5 = vld [vmem:[#allocation5 + $0x18] sm:$0xff]   ;;  %v759_v42 = vmov 0  }
  0x4c   :  { %559 = vmatprep.subr.bf16.mxu1 %v757_v0  ;;  %575 = vmatprep.mubr.msk.bf16.mxu1 %vm758_vm0, %v757_v0  ;;  %v600_v6 = vld [vmem:[#allocation7 + $0x8] sm:$0xff]   ;;  %v595_v7 = vld [vmem:[#allocation5 + $0x20] sm:$0xff]   ;;  %v601_v8 = vld [vmem:[#allocation7 + $0x10] sm:$0xff]   ;;  %v327_v52 = vshrl.u32 %v326_v51, 7 }
  0x4d   :  { %540 = vmatpush3.bf16.msra.mxu0 %v591_v1  ;;  %560 = vmatpush3.bf16.msra.mxu1 %v599_v4  ;;  %v596_v9 = vld [vmem:[#allocation5 + $0x28] sm:$0xff]   ;;  %v602_v10 = vld [vmem:[#allocation7 + $0x18] sm:$0xff]   ;;  %v597_v11 = vld [vmem:[#allocation5 + $0x30] sm:$0xff]  }
  0x4e   :  { %541 = vmatprep.subr.bf16.mxu0 %v757_v0  ;;  %561 = vmatprep.subr.bf16.mxu1 %v757_v0  ;;  %v603_v12 = vld [vmem:[#allocation7 + $0x20] sm:$0xff]   ;;  %v598_v13 = vld [vmem:[#allocation5 + $0x38] sm:$0xff]   ;;  %v604_v14 = vld [vmem:[#allocation7 + $0x28] sm:$0xff]   ;;  %v328_v53 = vsub.s32 0, %v327_v52  ;;  %v332_v55 = vsub.s32 1, %v327_v52 }
  0x4f   :  { %v81_v15 = vld [vmem:[#allocation2] sm:$0xf]  ;;  %v605_v16 = vld [vmem:[#allocation7 + $0x30] sm:$0xff]   ;;  %v607_v18 = vld [vmem:[#allocation8] ss:$8 sps:$4 sm:$0xff]  }
  0x50   :  { %v606_v17 = vld [vmem:[#allocation7 + $0x38] sm:$0xff]   ;;  %v609_v19 = vld [vmem:[#allocation8 + $0x4] ss:$8 sps:$4 sm:$0xff]   ;;  %v613_v23 = vld [vmem:[#allocation8 + $0x20] ss:$8 sps:$4 sm:$0xff]  }
  0x51   :  { %542 = vmatpush3.bf16.msra.mxu0 %v592_v2  ;;  %562 = vmatpush3.bf16.msra.mxu1 %v600_v6  ;;  %v612_v20 = vld [vmem:[#allocation8 + $0x14] ss:$8 sps:$4 sm:$0xff]   ;;  %v610_v21 = vld [vmem:[#allocation8 + $0x10] ss:$8 sps:$4 sm:$0xff]   ;;  %v615_v22 = vld [vmem:[#allocation8 + $0x24] ss:$8 sps:$4 sm:$0xff]  }
  0x52   :  { %543 = vmatprep.subr.bf16.mxu0 %v757_v0  ;;  %563 = vmatprep.subr.bf16.mxu1 %v757_v0  ;;  %v618_v24 = vld [vmem:[#allocation8 + $0x34] ss:$8 sps:$4 sm:$0xff]   ;;  %v616_v25 = vld [vmem:[#allocation8 + $0x30] ss:$8 sps:$4 sm:$0xff]   ;;  %v621_v26 = vld [vmem:[#allocation8 + $0x44] ss:$8 sps:$4 sm:$0xff]  }
  0x53   :  { %v619_v27 = vld [vmem:[#allocation8 + $0x40] ss:$8 sps:$4 sm:$0xff]   ;;  %v624_v28 = vld [vmem:[#allocation8 + $0x54] ss:$8 sps:$4 sm:$0xff]   ;;  %v622_v29 = vld [vmem:[#allocation8 + $0x50] ss:$8 sps:$4 sm:$0xff]  }
  0x54   :  { %v627_v30 = vld [vmem:[#allocation8 + $0x64] ss:$8 sps:$4 sm:$0xff]   ;;  %v625_v31 = vld [vmem:[#allocation8 + $0x60] ss:$8 sps:$4 sm:$0xff]   ;;  %v487_v32 = vld [vmem:[%s878_s2] ss:$0 sm:$0xff] }
  0x55   :  { %544 = vmatpush3.bf16.msra.mxu0 %v593_v3  ;;  %564 = vmatpush3.bf16.msra.mxu1 %v601_v8  ;;  %v630_v40 = vld [vmem:[#allocation8 + $0x74] ss:$8 sps:$4 sm:$0xff]   ;;  %v628_v41 = vld [vmem:[#allocation8 + $0x70] ss:$8 sps:$4 sm:$0xff]  }
  0x56   :  { %545 = vmatprep.subr.bf16.mxu0 %v757_v0  ;;  %565 = vmatprep.subr.bf16.mxu1 %v757_v0  ;;  %v496_v43 = vld [vmem:[%s880_s4] ss:$0 sm:$0xff]  ;;  %s760_s4 = smov [#allocation10]  }
  0x57   :  { %v324_v54 = vld [vmem:[%s882_s6] sm:$0x3]  ;;  %s476_s30 = sshll.u32 %s760_s4, 4  ;;  %s477_s30 = int_to_ptr.vmem [resolvable:$true] %s476_s30 }
  0x58   :  { %v329_v56 = vrot.slane %v324_v54, %v328_v53  ;;  %v333_v57 = vrot.slane %v324_v54, %v332_v55  ;;  %s719_s8 = scalar_lea.vmem %s477_s30, 256  ;;  %p724_p5 = scmp.lt.s32.totalorder %s477_s30, %s477_s30 }
  0x59   :  { %546 = vmatpush3.bf16.msra.mxu0 %v594_v5  ;;  %566 = vmatpush3.bf16.msra.mxu1 %v602_v10  ;;  %p720_p4 = scmp.ne.s32.totalorder %s477_s30, %s719_s8  ;;  %p725_p6 = scmp.lt.s32.totalorder %s719_s8, %s719_s8 }
  0x5a   :  { %547 = vmatprep.subr.bf16.mxu0 %v757_v0  ;;  %567 = vmatprep.subr.bf16.mxu1 %v757_v0 }
  0x5b   :  { %p726_p7 = por %p725_p6, %p724_p5 }
  0x5d   :  { %548 = vmatpush3.bf16.msra.mxu0 %v595_v7  ;;  %568 = vmatpush3.bf16.msra.mxu1 %v603_v12  ;;  %p727_p8 = pnand %p726_p7, %p720_p4 }
  0x5e   :  { %549 = vmatprep.subr.bf16.mxu0 %v757_v0  ;;  %569 = vmatprep.subr.bf16.mxu1 %v757_v0 }
  0x61   :  { %550 = vmatpush3.bf16.msra.mxu0 %v596_v9  ;;  %570 = vmatpush3.bf16.msra.mxu1 %v604_v14 }
  0x62   :  { %551 = vmatprep.subr.bf16.mxu0 %v757_v0  ;;  %571 = vmatprep.subr.bf16.mxu1 %v757_v0 }
  0x65   :  { %552 = vmatpush3.bf16.msra.mxu0 %v597_v11  ;;  %572 = vmatpush3.bf16.msra.mxu1 %v605_v16 }
  0x66   :  { %553 = vmatprep.subr.bf16.mxu0 %v757_v0  ;;  %573 = vmatprep.subr.bf16.mxu1 %v757_v0 }
  0x69   :  { %554 = vmatpush3.bf16.msra.mxu0 %v598_v13  ;;  %574 = vmatpush3.bf16.msra.mxu1 %v606_v17 }
  0x6a   :  { %416 = vmatprep.subr.bf16.mxu0 %v609_v19 }
  0x6c   :  { %556 = vmatmul.mubr.bf16.vlgmr.msra.gmra.mrb[0].mxu0 %v81_v15 }
  0x6d   :  { %417 = vmatpush1.bf16.msra.mxu0 %v607_v18  ;;  %448 = vmatprep.mubr.bf16.mxu0 %v759_v42 }
  0x6e   :  { %418 = vmatprep.subr.bf16.mxu0 %v612_v20 }
  0x71   :  { %419 = vmatpush1.bf16.msra.mxu0 %v610_v21 }
  0x72   :  { %420 = vmatprep.subr.bf16.mxu0 %v615_v22 }
  0x75   :  { %421 = vmatpush1.bf16.msra.mxu0 %v613_v23 }
  0x76   :  { %422 = vmatprep.subr.bf16.mxu0 %v618_v24 }
  0x79   :  { %423 = vmatpush1.bf16.msra.mxu0 %v616_v25 }
  0x7a   :  { %424 = vmatprep.subr.bf16.mxu0 %v621_v26 }
  0x7d   :  { %425 = vmatpush1.bf16.msra.mxu0 %v619_v27 }
  0x7e   :  { %426 = vmatprep.subr.bf16.mxu0 %v624_v28 }
  0x81   :  { %427 = vmatpush1.bf16.msra.mxu0 %v622_v29 }
  0x82   :  { %428 = vmatprep.subr.bf16.mxu0 %v627_v30 }
  0x85   :  { %429 = vmatpush1.bf16.msra.mxu0 %v625_v31 }
  0x86   :  { %430 = vmatprep.subr.bf16.mxu0 %v630_v40 }
  0x89   :  { %431 = vmatpush1.bf16.msra.mxu0 %v628_v41 }
 0x13f   :  { %v187_v33 = vpop.f32.mrb[0].mxu0 }
 0x140   :  { %v188_v34 = vadd.f32 %v487_v32, %v187_v33  ;;  %v557_v35 = vpop.f32.mrb[1].mxu0 }
 0x141   :  { %v190_v36 = vpop.f32.mrb[2].mxu0 }
 0x142   :  { %v193_v37 = vmax.f32 %v188_v34, 0.0  ;;  %v558_v38 = vpop.f32.mrb[3].mxu0 }
 0x144   :  { %v194_v39 = vpack.c.bf16 %v193_v37, %v193_v37 }
 0x146   :  { %576 = vmatmul.mubr.bf16.vlgmr.msra.gmra.mrb[0].mxu1 %v194_v39 }
 0x219   :  { %v300_v44 = vpop.f32.mrb[0].mxu1 }
 0x21a   :  { %v301_v45 = vadd.f32 %v496_v43, %v300_v44  ;;  %v577_v46 = vpop.f32.mrb[1].mxu1 }
 0x21b   :  { %v303_v47 = vpop.f32.mrb[2].mxu1 }
 0x21c   :  { %v306_v48 = vmax.f32 %v301_v45, 0.0  ;;  %v578_v49 = vpop.f32.mrb[3].mxu1 }
 0x21e   :  { %v307_v50 = vpack.c.bf16 %v306_v48, %v306_v48 }
 0x220   :  { %449 = vmatmul.mubr.bf16.vlgmr.msra.gmra.mrb[4].mxu0 %v307_v50 }
 0x2f3   :  { %v450_v58 = vpop.f32.mrb[4].mxu0 }
 0x2f4   :  { %v451_v59 = vadd.f32 %v450_v58, %v329_v56  ;;  %v452_v60 = vpop.f32.mrb[5].mxu0 }
 0x2f5   :  { %v453_v61 = vadd.f32 %v452_v60, %v333_v57  ;;  %v454_v62 = vpop.f32.mrb[6].mxu0 }
 0x2f6   :  { %468 = vst [vmem:[#allocation10] sm:$0xff] %v451_v59  ;;  %v455_v63 = vpop.f32.mrb[7].mxu0 }
 0x2f7   :  { %v463_v0 = vmax.f32 %v453_v61, -20.0 }
 0x2f9   :  { %v465_v1 = vmin.f32 %v463_v0, 2.0 }
 0x2fb   :  { %469 = vst [vmem:[#allocation10 + $0x8] sm:$0xff] %v465_v1 }
 0x2fc   :  { %730 = shalt.err (!%p727_p8)
}
 0x2fd   :  { %s731_s10 = scalar_lea.hbm %s883_s7, 256 }
 0x2fe   :  { %p732_p9 = scmp.ne.s32.totalorder %s883_s7, %s731_s10  ;;  %p735_p10 = scmp.lt.u32.totalorder %s731_s10, %s883_s7 }
 0x300   :  { %p737_p11 = pnand %p735_p10, %p732_p9 }
 0x302   :  { %740 = shalt.err (!%p737_p11)
}
 0x303   :  { %479 = dma.vmem_to_hbm [thread:$0]  %s477_s30, 256, %s883_s7, [#allocation4]  }
 0x304   :  { %747 = dma.done.wait [#allocation4], 256  }
 0x305   :  { %748 = vsyncadd [#allocation4], 4294967040 }
 0x306   :  { %483 = vsyncpa [#allocation3], 1 }
 0x307   :  { %484 = vsyncpa [#allocation6], 1 }
 0x308   :  { %485 = vsyncpa [#allocation9], 1 }
 0x309   :  { %486 = vsyncpa [#allocation4], 1 }

</bundles_post_ra>
